<compile_context>
chip_gen: v6e
topology: v6e:2x2x1
jax: 0.10.0
libtpu: 0.0.40
codegen_flags: <defaults>
</compile_context>

<pallas_src>
import math

import jax
import jax.numpy as jnp
from jax.experimental import pallas as pl
from jax.experimental.pallas import tpu as pltpu


def _round_up(v, m):
    return ((v + m - 1) // m) * m


def padded_num_nodes(num_nodes, *, tile_m=256, tile_k=512, fused_max_rows=1024):
    """Padded node count so A_norm tiles exactly for the chosen path."""
    n_fused = _round_up(num_nodes, 128)
    if n_fused <= fused_max_rows:
        return n_fused
    align = tile_m * tile_k // math.gcd(tile_m, tile_k)
    return _round_up(num_nodes, align)


# ----------------------------- kernels --------------------------------------

def _make_fused_kernel(alpha):
    """Single grid step: out = PReLU(A @ (X @ W) + b); everything VMEM-resident."""
    def kernel(a_ref, x_ref, w_ref, b_ref, o_ref):
        h = jnp.dot(x_ref[...], w_ref[...], preferred_element_type=jnp.float32)
        y = jnp.dot(a_ref[...], h.astype(a_ref.dtype),
                    preferred_element_type=jnp.float32) + b_ref[...]
        o_ref[...] = jnp.where(y > 0, y, alpha * y).astype(o_ref.dtype)
    return kernel


def _xw_kernel(x_ref, w_ref, h_ref):
    """Row-tiled feature transform: H_tile = X_tile @ W (each row computed once)."""
    h_ref[...] = jnp.dot(
        x_ref[...], w_ref[...], preferred_element_type=jnp.float32
    ).astype(h_ref.dtype)


def _make_agg_kernel(alpha):
    """K-tiled aggregation: acc += A[i,k] @ H[k]; PReLU(acc + b) stored at last k."""
    def kernel(a_ref, h_ref, b_ref, o_ref, acc_ref):
        k = pl.program_id(1)

        @pl.when(k == 0)
        def _():
            acc_ref[...] = jnp.zeros_like(acc_ref)

        acc_ref[...] += jnp.dot(a_ref[...], h_ref[...],
                                preferred_element_type=jnp.float32)

        @pl.when(k == pl.num_programs(1) - 1)
        def _():
            y = acc_ref[...] + b_ref[...]
            o_ref[...] = jnp.where(y > 0, y, alpha * y).astype(o_ref.dtype)
    return kernel


# ----------------------------- wrapper ---------------------------------------

def planetoid_gcn_forward(x, a_pad, weight, bias, alpha, *,
                          compute_dtype=jnp.bfloat16,
                          tile_m=256, tile_k=512, fused_max_rows=1024):
    """out = PReLU(A_norm @ (X @ W) + b), all compute inside Pallas kernels.

    x:       (N, F_in) node features.
    a_pad:   (n_p, n_p) normalized adjacency, already zero-padded (rows/cols
             beyond N are zero) and ideally already in compute_dtype — build
             it once with build_normalized_adjacency and reuse across calls.
    compute_dtype: jnp.bfloat16 (default, all MXU generations are native bf16;
             accumulation stays f32) or jnp.float32 (exact path).
    tile_m / tile_k: row / reduction tiles for the two-pass path (tile_m % 8
             == 0, tile_k % 128 == 0, both must divide n_p).
    fused_max_rows: run the single-step fused kernel when n_p <= this.
    """
    N, f_in = x.shape
    f_out = weight.shape[1]
    n_p = a_pad.shape[0]
    assert a_pad.shape == (n_p, n_p) and n_p >= N

    cd = jnp.dtype(compute_dtype)
    eb = cd.itemsize
    alpha_f = float(alpha)

    f_in_p = _round_up(f_in, 128)        # lane-dense K for the first matmul
    f_out_p = _round_up(f_out, 128)      # lane-dense output stores / MXU N-dim

    a_pad = a_pad.astype(cd)             # no-op when prebuilt in compute dtype
    zero = jnp.zeros((), cd)
    x_p = jax.lax.pad(x.astype(cd), zero,
                      ((0, n_p - N, 0), (0, f_in_p - f_in, 0)))
    w_p = jax.lax.pad(weight.astype(cd), zero,
                      ((0, f_in_p - f_in, 0), (0, f_out_p - f_out, 0)))
    b_p = jax.lax.pad(bias.astype(jnp.float32).reshape(1, f_out),
                      jnp.zeros((), jnp.float32),
                      ((0, 0, 0), (0, f_out_p - f_out, 0)))

    if n_p <= fused_max_rows:
        # Whole (padded) problem is VMEM-resident -> one grid step, both
        # matmuls in one invocation, no H round-trip through HBM.
        vmem_need = 2 * (n_p * n_p * eb + n_p * f_in_p * eb
                         + f_in_p * f_out_p * eb + n_p * f_out_p * 4
                         + f_out_p * 4)
        out = pl.pallas_call(
            _make_fused_kernel(alpha_f),
            out_shape=jax.ShapeDtypeStruct((n_p, f_out_p), jnp.float32),
            grid_spec=pl.GridSpec(
                grid=(1,),
                in_specs=[
                    pl.BlockSpec((n_p, n_p), lambda i: (0, 0)),           # A
                    pl.BlockSpec((n_p, f_in_p), lambda i: (0, 0)),        # X
                    pl.BlockSpec((f_in_p, f_out_p), lambda i: (0, 0)),    # W
                    pl.BlockSpec((1, f_out_p), lambda i: (0, 0)),         # bias
                ],
                out_specs=pl.BlockSpec((n_p, f_out_p), lambda i: (0, 0)),
            ),
            compiler_params=pltpu.CompilerParams(
                dimension_semantics=("arbitrary",),
                vmem_limit_bytes=int(min(max(vmem_need + (8 << 20), 32 << 20),
                                         64 << 20))),
        )(a_pad, x_p, w_p, b_p)
        return out[:N, :f_out]

    # ---- tiled path: H = X @ W once, then K-tiled aggregation ---------------
    assert tile_m % 8 == 0 and tile_k % 128 == 0, "tile_m % 8, tile_k % 128"
    assert n_p % tile_m == 0 and n_p % tile_k == 0, \
        "pad A_norm with padded_num_nodes(..., tile_m, tile_k)"

    grid_m = n_p // tile_m
    grid_k = n_p // tile_k

    # Pass 1: H (emitted in the compute dtype -> halves its HBM traffic).
    xw_vmem = 2 * (tile_m * f_in_p * eb + f_in_p * f_out_p * eb
                   + tile_m * f_out_p * eb)
    h = pl.pallas_call(
        _xw_kernel,
        out_shape=jax.ShapeDtypeStruct((n_p, f_out_p), cd),
        grid_spec=pl.GridSpec(
            grid=(grid_m,),
            in_specs=[
                pl.BlockSpec((tile_m, f_in_p), lambda i: (i, 0)),         # X tile
                pl.BlockSpec((f_in_p, f_out_p), lambda i: (0, 0)),        # W resident
            ],
            out_specs=pl.BlockSpec((tile_m, f_out_p), lambda i: (i, 0)),
        ),
        compiler_params=pltpu.CompilerParams(
            dimension_semantics=("parallel",),
            vmem_limit_bytes=int(min(max(xw_vmem + (8 << 20), 32 << 20),
                                     64 << 20))),
    )(x_p, w_p)

    # Pass 2: out = PReLU(A @ H + b).  VMEM is O(tile_m * tile_k), independent
    # of N, so it fits v7x's 64 MiB/TC; the row axis is megacore-parallel.
    agg_vmem = (2 * tile_m * tile_k * eb          # A double-buffer
                + 2 * tile_k * f_out_p * eb       # H double-buffer
                + 2 * tile_m * f_out_p * 4        # out double-buffer
                + tile_m * f_out_p * 4            # f32 accumulator scratch
                + 2 * f_out_p * 4)                # bias
    cost = pl.CostEstimate(
        flops=2 * n_p * n_p * f_out_p,
        transcendentals=0,
        bytes_accessed=(n_p * n_p * eb            # A (dominant HBM stream)
                        + n_p * f_out_p * eb      # H
                        + n_p * f_out_p * 4       # out
                        + f_out_p * 4))
    out = pl.pallas_call(
        _make_agg_kernel(alpha_f),
        out_shape=jax.ShapeDtypeStruct((n_p, f_out_p), jnp.float32),
        grid_spec=pltpu.PrefetchScalarGridSpec(
            num_scalar_prefetch=0,
            grid=(grid_m, grid_k),
            in_specs=[
                pl.BlockSpec((tile_m, tile_k), lambda i, k: (i, k)),      # A block
                pl.BlockSpec((tile_k, f_out_p), lambda i, k: (k, 0)),     # H block
                pl.BlockSpec((1, f_out_p), lambda i, k: (0, 0)),          # bias
            ],
            out_specs=pl.BlockSpec((tile_m, f_out_p), lambda i, k: (i, 0)),
            scratch_shapes=[pltpu.VMEM((tile_m, f_out_p), jnp.float32)],
        ),
        compiler_params=pltpu.CompilerParams(
            dimension_semantics=("parallel", "arbitrary"),
            vmem_limit_bytes=int(min(max(agg_vmem * 2, 32 << 20), 64 << 20))),
        cost_estimate=cost,
    )(a_pad, h, b_p)
    return out[:N, :f_out]


# ----------------------------- graph glue ------------------------------------

def build_normalized_adjacency(edge_index, num_nodes, *, pad_to=None,
                               dtype=jnp.bfloat16):
    """gcn_norm with add_self_loops=False, edge_weight=1, built ALREADY padded
    to (pad_to, pad_to) and in the compute dtype (cache/reuse across calls).

    Padded rows/cols have no edges so their degree is 0 and they stay zero —
    the normalization of real nodes is unchanged.  Uses .max(1.0) so
    duplicate / colliding edges keep weight 1 (matching a coalesced edge_index).
    """
    n_p = num_nodes if pad_to is None else pad_to
    assert n_p >= num_nodes
    src, dst = edge_index[0], edge_index[1]
    a = jnp.zeros((n_p, n_p), jnp.float32)
    a = a.at[dst, src].max(1.0)               # message from src j into dst i
    deg = a.sum(axis=1)
    deg_inv_sqrt = jnp.where(deg > 0, jax.lax.rsqrt(jnp.maximum(deg, 1e-12)), 0.0)
    a = deg_inv_sqrt[:, None] * a * deg_inv_sqrt[None, :]
    return a.astype(dtype)


def reference_forward(x, a_norm, weight, bias, alpha):
    y = a_norm @ (x @ weight) + bias[None, :]
    return jnp.where(y > 0, y, alpha * y)


# ----------------------------- main ------------------------------------------

if __name__ == "__main__":
    key = jax.random.PRNGKey(0)
    k_x, k_w, k_b, k_e = jax.random.split(key, 4)

    N = 128          # number of nodes
    F_IN = 64        # input_size
    F_OUT = 32       # output_size

    # Node features X0
    x = jax.random.normal(k_x, (N, F_IN), jnp.float32)

    # Synthetic GCNConv weight (F_IN, F_OUT), bias, PReLU alpha (default 0.25)
    weight = jax.random.normal(k_w, (F_IN, F_OUT), jnp.float32) * (1.0 / jnp.sqrt(F_IN))
    bias = jax.random.normal(k_b, (F_OUT,), jnp.float32) * 0.01
    alpha = 0.25

    # Deterministic graph edge_index (stand-in for L0.coalesce().indices()):
    # symmetric ring plus a few extra symmetric edges.
    idx = jnp.arange(N)
    ring_src = jnp.concatenate([idx, (idx + 1) % N])
    ring_dst = jnp.concatenate([(idx + 1) % N, idx])
    extra = jax.random.randint(k_e, (2, 32), 0, N)
    src = jnp.concatenate([ring_src, extra[0], extra[1]])
    dst = jnp.concatenate([ring_dst, extra[1], extra[0]])
    edge_index = jnp.stack([src, dst])

    # Exact (f32, unpadded) adjacency for the reference.
    a_exact = build_normalized_adjacency(edge_index, N, dtype=jnp.float32)
    ref = reference_forward(x, a_exact, weight, bias, alpha)

    # 1) fused single-step kernel, bf16 default compute (f32 accumulation)
    n_p = padded_num_nodes(N)                                    # 128 -> fused path
    a_bf16 = build_normalized_adjacency(edge_index, N, pad_to=n_p,
                                        dtype=jnp.bfloat16)
    out_bf16 = jax.block_until_ready(
        planetoid_gcn_forward(x, a_bf16, weight, bias, alpha))
    assert out_bf16.shape == (N, F_OUT)
    assert jnp.allclose(out_bf16, ref, atol=5e-2, rtol=5e-2)

    # 2) fused single-step kernel, f32 exact path
    a_f32 = build_normalized_adjacency(edge_index, N, pad_to=n_p,
                                       dtype=jnp.float32)
    out_f32 = jax.block_until_ready(
        planetoid_gcn_forward(x, a_f32, weight, bias, alpha,
                              compute_dtype=jnp.float32))
    assert jnp.allclose(out_f32, ref, atol=1e-4, rtol=1e-4)

    # 3) tiled two-pass path (forced), f32: grid = (4 row blocks, 2 K blocks)
    n_p_t = 256
    a_f32_t = build_normalized_adjacency(edge_index, N, pad_to=n_p_t,
                                         dtype=jnp.float32)
    out_tiled = jax.block_until_ready(
        planetoid_gcn_forward(x, a_f32_t, weight, bias, alpha,
                              compute_dtype=jnp.float32,
                              tile_m=64, tile_k=128, fused_max_rows=0))
    assert jnp.allclose(out_tiled, ref, atol=1e-4, rtol=1e-4)

    # 4) tiled two-pass path, bf16 default compute
    a_bf16_t = build_normalized_adjacency(edge_index, N, pad_to=n_p_t,
                                          dtype=jnp.bfloat16)
    out_tiled_bf16 = jax.block_until_ready(
        planetoid_gcn_forward(x, a_bf16_t, weight, bias, alpha,
                              tile_m=64, tile_k=128, fused_max_rows=0))
    assert jnp.allclose(out_tiled_bf16, ref, atol=5e-2, rtol=5e-2)

    print("KERNEL_OK")
</pallas_src>

<mosaic_0001>
module attributes {stable_mosaic.version = 11 : i64} {
  func.func @kernel(%arg0: i32, %arg1: memref<128x128xbf16, #tpu.memory_space<vmem>>, %arg2: memref<128x128xbf16, #tpu.memory_space<vmem>>, %arg3: memref<128x128xbf16, #tpu.memory_space<vmem>>, %arg4: memref<1x128xf32, #tpu.memory_space<vmem>>, %arg5: memref<128x128xf32, #tpu.memory_space<vmem>>) attributes {dimension_semantics = [#tpu.dimension_semantics<arbitrary>], iteration_bounds = array<i64: 1>, scalar_prefetch = 0 : i64, scratch_operands = 0 : i64, tpu.core_type = #tpu.core_type<tc>, window_params = [{pipeline_mode = #tpu.pipeline_mode<synchronous>, transform_indices = @transform_0, window_bounds = array<i64: 128, 128>}, {pipeline_mode = #tpu.pipeline_mode<synchronous>, transform_indices = @transform_1, window_bounds = array<i64: 128, 128>}, {pipeline_mode = #tpu.pipeline_mode<synchronous>, transform_indices = @transform_2, window_bounds = array<i64: 128, 128>}, {pipeline_mode = #tpu.pipeline_mode<synchronous>, transform_indices = @transform_3, window_bounds = array<i64: 1, 128>}, {pipeline_mode = #tpu.pipeline_mode<synchronous>, transform_indices = @transform_4, window_bounds = array<i64: 128, 128>}]} {
    %c0 = arith.constant 0 : index
    %c0_0 = arith.constant 0 : index
    %0 = vector.load %arg2[%c0, %c0_0] : memref<128x128xbf16, #tpu.memory_space<vmem>>, vector<128x128xbf16>
    %c0_1 = arith.constant 0 : index
    %c0_2 = arith.constant 0 : index
    %1 = vector.load %arg3[%c0_1, %c0_2] : memref<128x128xbf16, #tpu.memory_space<vmem>>, vector<128x128xbf16>
    %cst = arith.constant dense<0.000000e+00> : vector<128x128xf32>
    %2 = tpu.matmul %0, %1, %cst {dimension_numbers = #tpu.dot_dimension_numbers<[1], [0], [0], [1], [0, 0, 1, 1], [], []>} : vector<128x128xbf16>, vector<128x128xbf16>, vector<128x128xf32> -> vector<128x128xf32>
    %c0_3 = arith.constant 0 : index
    %c0_4 = arith.constant 0 : index
    %3 = vector.load %arg1[%c0_3, %c0_4] : memref<128x128xbf16, #tpu.memory_space<vmem>>, vector<128x128xbf16>
    %4 = arith.truncf %2 : vector<128x128xf32> to vector<128x128xbf16>
    %cst_5 = arith.constant dense<0.000000e+00> : vector<128x128xf32>
    %5 = tpu.matmul %3, %4, %cst_5 {dimension_numbers = #tpu.dot_dimension_numbers<[1], [0], [0], [1], [0, 0, 1, 1], [], []>} : vector<128x128xbf16>, vector<128x128xbf16>, vector<128x128xf32> -> vector<128x128xf32>
    %c0_6 = arith.constant 0 : index
    %c0_7 = arith.constant 0 : index
    %6 = vector.load %arg4[%c0_6, %c0_7] : memref<1x128xf32, #tpu.memory_space<vmem>>, vector<1x128xf32>
    %7 = vector.broadcast %6 : vector<1x128xf32> to vector<128x128xf32>
    %8 = arith.addf %5, %7 : vector<128x128xf32>
    %cst_8 = arith.constant 0.000000e+00 : f32
    %9 = vector.broadcast %cst_8 : f32 to vector<128x128xf32>
    %10 = arith.cmpf ogt, %8, %9 : vector<128x128xf32>
    %cst_9 = arith.constant 2.500000e-01 : f32
    %11 = vector.broadcast %cst_9 : f32 to vector<128x128xf32>
    %12 = arith.mulf %11, %8 : vector<128x128xf32>
    %13 = arith.select %10, %8, %12 : vector<128x128xi1>, vector<128x128xf32>
    %c0_10 = arith.constant 0 : index
    %c0_11 = arith.constant 0 : index
    %14 = vector.load %arg5[%c0_10, %c0_11] : memref<128x128xf32, #tpu.memory_space<vmem>>, vector<128x128xf32>
    tpu.vector_store %arg5[%c0_10, %c0_11], %13 {strides = array<i32>} : memref<128x128xf32, #tpu.memory_space<vmem>>, vector<128x128xf32>,
    return
  }
  func.func @transform_0(%arg0: i32) -> (i32, i32) {
    %c0_i32 = arith.constant 0 : i32
    %c0_i32_0 = arith.constant 0 : i32
    %c0_i32_1 = arith.constant 0 : i32
    return %c0_i32, %c0_i32_0 : i32, i32
  }
  func.func @transform_1(%arg0: i32) -> (i32, i32) {
    %c0_i32 = arith.constant 0 : i32
    %c0_i32_0 = arith.constant 0 : i32
    %c0_i32_1 = arith.constant 0 : i32
    return %c0_i32, %c0_i32_0 : i32, i32
  }
  func.func @transform_2(%arg0: i32) -> (i32, i32) {
    %c0_i32 = arith.constant 0 : i32
    %c0_i32_0 = arith.constant 0 : i32
    %c0_i32_1 = arith.constant 0 : i32
    return %c0_i32, %c0_i32_0 : i32, i32
  }
  func.func @transform_3(%arg0: i32) -> (i32, i32) {
    %c0_i32 = arith.constant 0 : i32
    %c0_i32_0 = arith.constant 0 : i32
    %c0_i32_1 = arith.constant 0 : i32
    return %c0_i32, %c0_i32_0 : i32, i32
  }
  func.func @transform_4(%arg0: i32) -> (i32, i32) {
    %c0_i32 = arith.constant 0 : i32
    %c0_i32_0 = arith.constant 0 : i32
    %c0_i32_1 = arith.constant 0 : i32
    return %c0_i32, %c0_i32_0 : i32, i32
  }
}

</mosaic_0001>

<bundles_post_ra>
// kernel: tpu_custom_call.1
= control target key start
LH: loop header
LB: loop body
LE: loop exit
PB: predicated region body
PF: predicated region fallthrough
CT: control target
= control target key end

     0   :  { %9 = vsyncpa [#allocation3], 0  ;;  %s848_s0 = inlined_call_operand.hbm [shape: bf16[128,128], index: 0, kind: input, shape index: {}]   ;;  %s849_s1 = inlined_call_operand.hbm [shape: bf16[128,128], index: 1, kind: input, shape index: {}]   ;;  %s850_s2 = inlined_call_operand.hbm [shape: bf16[128,128], index: 2, kind: input, shape index: {}]   ;;  %s851_s3 = inlined_call_operand.vmem [shape: f32[1,128], index: 3, kind: input, shape index: {}]   ;;  %s852_s4 = inlined_call_operand.hbm [shape: f32[128,128], index: 4, kind: output, shape index: {}]  }
   0x1   :  { %10 = vsyncpa [#allocation6], 0 }
   0x2   :  { %11 = vsyncpa [#allocation4], 0  ;;  %s782_s15 = smov [#allocation5]   ;;  %s783_s17 = smov [#allocation2]  }
   0x3   :  { %s29_s16 = sshll.u32 %s782_s15, 4  ;;  %s17_s18 = sshll.u32 %s783_s17, 4  ;;  %s30_s16 = int_to_ptr.vmem [resolvable:$true] %s29_s16  ;;  %s18_s18 = int_to_ptr.vmem [resolvable:$true] %s17_s18 }
   0x4   :  { %s704_s19 = scalar_lea.vmem %s30_s16, 1024  ;;  %p709_p1 = scmp.lt.s32.totalorder %s30_s16, %s30_s16 }
   0x5   :  { %p705_p0 = scmp.ne.s32.totalorder %s30_s16, %s704_s19  ;;  %p710_p2 = scmp.lt.s32.totalorder %s704_s19, %s704_s19 }
   0x7   :  { %p711_p3 = por %p710_p2, %p709_p1 }
   0x9   :  { %p712_p4 = pnand %p711_p3, %p705_p0 }
   0xb   :  { %715 = shalt.err (!%p712_p4)
}
   0xc   :  { %s784_s20 = smov 64   ;;  %s785_s21 = smov 4  }
   0xd   :  { %35 = dma.hbm_to_vmem [thread:$0]  %s849_s1, 1024, %s30_s16, [#allocation6], %s784_s20, %s784_s20, %s785_s21  }
   0xe   :  { %s724_s24 = scalar_lea.vmem %s18_s18, 1024  ;;  %p729_p6 = scmp.lt.s32.totalorder %s18_s18, %s18_s18 }
   0xf   :  { %p725_p5 = scmp.ne.s32.totalorder %s18_s18, %s724_s24  ;;  %p730_p7 = scmp.lt.s32.totalorder %s724_s24, %s724_s24 }
  0x11   :  { %p731_p8 = por %p730_p7, %p729_p6 }
  0x13   :  { %p732_p9 = pnand %p731_p8, %p725_p5 }
  0x15   :  { %735 = shalt.err (!%p732_p9)
}
  0x16   :  { %23 = dma.hbm_to_vmem [thread:$0]  %s848_s0, 1024, %s18_s18, [#allocation3], %s784_s20, %s784_s20, %s785_s21  }
  0x17   :  { %s786_s27 = smov [#allocation7]  }
  0x18   :  { %s41_s28 = sshll.u32 %s786_s27, 4  ;;  %s42_s28 = int_to_ptr.vmem [resolvable:$true] %s41_s28 }
  0x19   :  { %s744_s29 = scalar_lea.vmem %s42_s28, 1024  ;;  %p749_p11 = scmp.lt.s32.totalorder %s42_s28, %s42_s28 }
  0x1a   :  { %p745_p10 = scmp.ne.s32.totalorder %s42_s28, %s744_s29  ;;  %p750_p12 = scmp.lt.s32.totalorder %s744_s29, %s744_s29 }
  0x1c   :  { %p751_p13 = por %p750_p12, %p749_p11 }
  0x1e   :  { %p752_p0 = pnand %p751_p13, %p745_p10 }
  0x20   :  { %755 = shalt.err (!%p752_p0)
}
  0x21   :  { %47 = dma.hbm_to_vmem [thread:$0]  %s850_s2, 1024, %s42_s28, [#allocation6], %s784_s20, %s784_s20, %s785_s21  }
  0x22   :  { %776 = dma.done.wait [#allocation3], 1024  }
  0x23   :  { %777 = vsyncadd [#allocation3], 4294966272 }
  0x24   :  { %778 = dma.done.wait [#allocation6], 2048  }
  0x25   :  { %779 = vsyncadd [#allocation6], 4294965248  ;;  %v672_v0 = vld [vmem:[#allocation7 + $0x38] sm:$0xff]   ;;  %v673_v1 = vld [vmem:[#allocation7 + $0x30] sm:$0xff]  }
  0x26   :  { %600 = vmatprep.subr.bf16.mxu0 %v672_v0  ;;  %v674_v2 = vld [vmem:[#allocation7 + $0x28] sm:$0xff]   ;;  %v675_v3 = vld [vmem:[#allocation7 + $0x20] sm:$0xff]   ;;  %v676_v5 = vld [vmem:[#allocation7 + $0x18] sm:$0xff]  }
  0x27   :  { %601 = vmatpush3.bf16.msra.mxu0 %v672_v0  ;;  %v680_v4 = vld [vmem:[#allocation5] sm:$0xff]   ;;  %v677_v6 = vld [vmem:[#allocation7 + $0x10] sm:$0xff]   ;;  %v678_v7 = vld [vmem:[#allocation7 + $0x8] sm:$0xff]  }
  0x28   :  { %602 = vmatprep.subr.bf16.mxu0 %v673_v1  ;;  %616 = vmatprep.mubr.bf16.mxu0 %v680_v4  ;;  %v679_v8 = vld [vmem:[#allocation7] sm:$0xff]   ;;  %v681_v9 = vld [vmem:[#allocation5 + $0x8] sm:$0xff]   ;;  %v682_v10 = vld [vmem:[#allocation5 + $0x10] sm:$0xff]  }
  0x29   :  { %v683_v11 = vld [vmem:[#allocation5 + $0x18] sm:$0xff]   ;;  %v684_v12 = vld [vmem:[#allocation5 + $0x20] sm:$0xff]   ;;  %v685_v13 = vld [vmem:[#allocation5 + $0x28] sm:$0xff]  }
  0x2a   :  { %v686_v14 = vld [vmem:[#allocation5 + $0x30] sm:$0xff]   ;;  %v687_v15 = vld [vmem:[#allocation5 + $0x38] sm:$0xff]   ;;  %v688_v16 = vld [vmem:[#allocation2] sm:$0xff]  }
  0x2b   :  { %603 = vmatpush3.bf16.msra.mxu0 %v673_v1  ;;  %648 = vmatprep.mubr.bf16.mxu1 %v688_v16  ;;  %v689_v41 = vld [vmem:[#allocation2 + $0x8] sm:$0xff]   ;;  %v690_v42 = vld [vmem:[#allocation2 + $0x10] sm:$0xff]   ;;  %v691_v43 = vld [vmem:[#allocation2 + $0x18] sm:$0xff]  }
  0x2c   :  { %604 = vmatprep.subr.bf16.mxu0 %v674_v2  ;;  %v692_v44 = vld [vmem:[#allocation2 + $0x20] sm:$0xff]   ;;  %v693_v45 = vld [vmem:[#allocation2 + $0x28] sm:$0xff]   ;;  %v694_v46 = vld [vmem:[#allocation2 + $0x30] sm:$0xff]  }
  0x2d   :  { %v695_v47 = vld [vmem:[#allocation2 + $0x38] sm:$0xff]   ;;  %v827_v48 = vld [vmem:[%s851_s3] ss:$0 sm:$0xff]  ;;  %s787_s3 = smov [#allocation8]  }
  0x2e   :  { %s530_s5 = sshll.u32 %s787_s3, 4  ;;  %s531_s5 = int_to_ptr.vmem [resolvable:$true] %s530_s5 }
  0x2f   :  { %605 = vmatpush3.bf16.msra.mxu0 %v674_v2  ;;  %s756_s6 = scalar_lea.vmem %s531_s5, 2048  ;;  %p761_p2 = scmp.lt.s32.totalorder %s531_s5, %s531_s5 }
  0x30   :  { %606 = vmatprep.subr.bf16.mxu0 %v675_v3  ;;  %p757_p1 = scmp.ne.s32.totalorder %s531_s5, %s756_s6  ;;  %p762_p3 = scmp.lt.s32.totalorder %s756_s6, %s756_s6 }
  0x32   :  { %p763_p4 = por %p762_p3, %p761_p2 }
  0x33   :  { %607 = vmatpush3.bf16.msra.mxu0 %v675_v3 }
  0x34   :  { %608 = vmatprep.subr.bf16.mxu0 %v676_v5  ;;  %p764_p5 = pnand %p763_p4, %p757_p1 }
  0x37   :  { %609 = vmatpush3.bf16.msra.mxu0 %v676_v5 }
  0x38   :  { %610 = vmatprep.subr.bf16.mxu0 %v677_v6 }
  0x3b   :  { %611 = vmatpush3.bf16.msra.mxu0 %v677_v6 }
  0x3c   :  { %612 = vmatprep.subr.bf16.mxu0 %v678_v7 }
  0x3f   :  { %613 = vmatpush3.bf16.msra.mxu0 %v678_v7 }
  0x40   :  { %614 = vmatprep.subr.bf16.mxu0 %v679_v8 }
  0x43   :  { %615 = vmatpush3.bf16.msra.mxu0 %v679_v8 }
  0x46   :  { %617 = vmatmul.mubr.bf16.vlgmr.msra.gmra.mxu0 %v681_v9 }
  0x47   :  { %620 = vmatprep.mubr.bf16.mxu0 %v682_v10 }
  0x4e   :  { %621 = vmatmul.mubr.bf16.gmra.mxu0 %v683_v11 }
  0x4f   :  { %624 = vmatprep.mubr.bf16.mxu0 %v684_v12 }
  0x56   :  { %625 = vmatmul.mubr.bf16.gmra.mxu0 %v685_v13 }
  0x57   :  { %628 = vmatprep.mubr.bf16.mxu0 %v686_v14 }
  0x5e   :  { %629 = vmatmul.mubr.bf16.gmra.mxu0 %v687_v15 }
 0x106   :  { %v618_v17 = vpop.f32.mrf.mxu0 }
 0x108   :  { %v222_v18 = vpop.f32.mrf.mxu0 }
 0x10a   :  { %v619_v19 = vpop.f32.mrf.mxu0 }
 0x10b   :  { %v302_v39 = vpack.c.bf16 %v619_v19, %v618_v17 }
 0x10c   :  { %v225_v20 = vpop.f32.mrf.mxu0 }
 0x10d   :  { %v301_v40 = vpack.c.bf16 %v225_v20, %v222_v18 }
 0x10e   :  { %v622_v21 = vpop.f32.mrf.mxu0 }
 0x110   :  { %v238_v22 = vpop.f32.mrf.mxu0 }
 0x112   :  { %v623_v23 = vpop.f32.mrf.mxu0 }
 0x113   :  { %v304_v37 = vpack.c.bf16 %v623_v23, %v622_v21 }
 0x114   :  { %v241_v24 = vpop.f32.mrf.mxu0 }
 0x115   :  { %v303_v38 = vpack.c.bf16 %v241_v24, %v238_v22 }
 0x116   :  { %v626_v25 = vpop.f32.mrf.mxu0 }
 0x118   :  { %v254_v26 = vpop.f32.mrf.mxu0 }
 0x11a   :  { %v627_v27 = vpop.f32.mrf.mxu0 }
 0x11b   :  { %v306_v35 = vpack.c.bf16 %v627_v27, %v626_v25 }
 0x11c   :  { %v257_v28 = vpop.f32.mrf.mxu0 }
 0x11d   :  { %v305_v36 = vpack.c.bf16 %v257_v28, %v254_v26 }
 0x11e   :  { %v630_v29 = vpop.f32.mrf.mxu0 }
 0x120   :  { %v270_v30 = vpop.f32.mrf.mxu0 }
 0x122   :  { %v631_v31 = vpop.f32.mrf.mxu0 }
 0x123   :  { %v308_v32 = vpack.c.bf16 %v631_v31, %v630_v29 }
 0x124   :  { %v273_v33 = vpop.f32.mrf.mxu0 }
 0x125   :  { %v307_v34 = vpack.c.bf16 %v273_v33, %v270_v30  ;;  %632 = vmatprep.subr.bf16.mxu1 %v308_v32 }
 0x126   :  { %633 = vmatpush3.bf16.msra.mxu1 %v308_v32 }
 0x127   :  { %634 = vmatprep.subr.bf16.mxu1 %v307_v34 }
 0x12a   :  { %635 = vmatpush3.bf16.msra.mxu1 %v307_v34 }
 0x12b   :  { %636 = vmatprep.subr.bf16.mxu1 %v306_v35 }
 0x12e   :  { %637 = vmatpush3.bf16.msra.mxu1 %v306_v35 }
 0x12f   :  { %638 = vmatprep.subr.bf16.mxu1 %v305_v36 }
 0x132   :  { %639 = vmatpush3.bf16.msra.mxu1 %v305_v36 }
 0x133   :  { %640 = vmatprep.subr.bf16.mxu1 %v304_v37 }
 0x136   :  { %641 = vmatpush3.bf16.msra.mxu1 %v304_v37 }
 0x137   :  { %642 = vmatprep.subr.bf16.mxu1 %v303_v38 }
 0x13a   :  { %643 = vmatpush3.bf16.msra.mxu1 %v303_v38 }
 0x13b   :  { %644 = vmatprep.subr.bf16.mxu1 %v302_v39 }
 0x13e   :  { %645 = vmatpush3.bf16.msra.mxu1 %v302_v39 }
 0x13f   :  { %646 = vmatprep.subr.bf16.mxu1 %v301_v40 }
 0x142   :  { %647 = vmatpush3.bf16.msra.mxu1 %v301_v40 }
 0x145   :  { %649 = vmatmul.mubr.bf16.vlgmr.msra.gmra.mxu1 %v689_v41 }
 0x146   :  { %652 = vmatprep.mubr.bf16.mxu1 %v690_v42 }
 0x14d   :  { %653 = vmatmul.mubr.bf16.gmra.mxu1 %v691_v43 }
 0x14e   :  { %656 = vmatprep.mubr.bf16.mxu1 %v692_v44 }
 0x155   :  { %657 = vmatmul.mubr.bf16.gmra.mxu1 %v693_v45 }
 0x156   :  { %660 = vmatprep.mubr.bf16.mxu1 %v694_v46 }
 0x15d   :  { %661 = vmatmul.mubr.bf16.gmra.mxu1 %v695_v47 }
 0x205   :  { %v650_v49 = vpop.f32.mrf.mxu1 }
 0x206   :  { %v407_v50 = vadd.f32 %v650_v49, %v827_v48 }
 0x207   :  { %v398_v51 = vpop.f32.mrf.mxu1 }
 0x208   :  { %vm463_vm0 = vcmp.gt.f32.partialorder %v407_v50, 0.0  ;;  %v479_v52 = vmul.f32 0.25, %v407_v50  ;;  %v399_v53 = vadd.f32 %v827_v48, %v398_v51 }
 0x209   :  { %v651_v54 = vpop.f32.mrf.mxu1 }
 0x20a   :  { %v495_v55 = vsel %vm463_vm0, %v407_v50, %v479_v52  ;;  %vm461_vm1 = vcmp.gt.f32.partialorder %v399_v53, 0.0  ;;  %v477_v56 = vmul.f32 0.25, %v399_v53  ;;  %v410_v57 = vadd.f32 %v651_v54, %v827_v48 }
 0x20b   :  { %511 = vst [vmem:[#allocation8 + $0x10] sm:$0xff] %v495_v55  ;;  %v401_v58 = vpop.f32.mrf.mxu1 }
 0x20c   :  { %v493_v59 = vsel %vm461_vm1, %v399_v53, %v477_v56  ;;  %vm464_vm2 = vcmp.gt.f32.partialorder %v410_v57, 0.0  ;;  %v480_v60 = vmul.f32 0.25, %v410_v57  ;;  %v402_v61 = vadd.f32 %v827_v48, %v401_v58 }
 0x20d   :  { %509 = vst [vmem:[#allocation8] sm:$0xff] %v493_v59  ;;  %v654_v62 = vpop.f32.mrf.mxu1 }
 0x20e   :  { %v496_v63 = vsel %vm464_vm2, %v410_v57, %v480_v60  ;;  %vm462_vm3 = vcmp.gt.f32.partialorder %v402_v61, 0.0  ;;  %v478_v0 = vmul.f32 0.25, %v402_v61  ;;  %v423_v1 = vadd.f32 %v654_v62, %v827_v48 }
 0x20f   :  { %512 = vst [vmem:[#allocation8 + $0x18] sm:$0xff] %v496_v63  ;;  %v414_v2 = vpop.f32.mrf.mxu1 }
 0x210   :  { %v494_v3 = vsel %vm462_vm3, %v402_v61, %v478_v0  ;;  %vm467_vm4 = vcmp.gt.f32.partialorder %v423_v1, 0.0  ;;  %v483_v4 = vmul.f32 0.25, %v423_v1  ;;  %v415_v5 = vadd.f32 %v827_v48, %v414_v2 }
 0x211   :  { %510 = vst [vmem:[#allocation8 + $0x8] sm:$0xff] %v494_v3  ;;  %v655_v6 = vpop.f32.mrf.mxu1 }
 0x212   :  { %v499_v7 = vsel %vm467_vm4, %v423_v1, %v483_v4  ;;  %vm465_vm5 = vcmp.gt.f32.partialorder %v415_v5, 0.0  ;;  %v481_v8 = vmul.f32 0.25, %v415_v5  ;;  %v426_v9 = vadd.f32 %v655_v6, %v827_v48 }
 0x213   :  { %515 = vst [vmem:[#allocation8 + $0x30] sm:$0xff] %v499_v7  ;;  %v417_v10 = vpop.f32.mrf.mxu1 }
 0x214   :  { %v497_v11 = vsel %vm465_vm5, %v415_v5, %v481_v8  ;;  %vm468_vm6 = vcmp.gt.f32.partialorder %v426_v9, 0.0  ;;  %v484_v12 = vmul.f32 0.25, %v426_v9  ;;  %v418_v13 = vadd.f32 %v827_v48, %v417_v10 }
 0x215   :  { %513 = vst [vmem:[#allocation8 + $0x20] sm:$0xff] %v497_v11  ;;  %v658_v14 = vpop.f32.mrf.mxu1 }
 0x216   :  { %v500_v15 = vsel %vm468_vm6, %v426_v9, %v484_v12  ;;  %vm466_vm7 = vcmp.gt.f32.partialorder %v418_v13, 0.0  ;;  %v482_v16 = vmul.f32 0.25, %v418_v13  ;;  %v439_v17 = vadd.f32 %v658_v14, %v827_v48 }
 0x217   :  { %516 = vst [vmem:[#allocation8 + $0x38] sm:$0xff] %v500_v15  ;;  %v430_v18 = vpop.f32.mrf.mxu1 }
 0x218   :  { %v498_v19 = vsel %vm466_vm7, %v418_v13, %v482_v16  ;;  %vm471_vm8 = vcmp.gt.f32.partialorder %v439_v17, 0.0  ;;  %v487_v20 = vmul.f32 0.25, %v439_v17  ;;  %v431_v21 = vadd.f32 %v827_v48, %v430_v18 }
 0x219   :  { %514 = vst [vmem:[#allocation8 + $0x28] sm:$0xff] %v498_v19  ;;  %v659_v22 = vpop.f32.mrf.mxu1 }
 0x21a   :  { %v503_v23 = vsel %vm471_vm8, %v439_v17, %v487_v20  ;;  %vm469_vm9 = vcmp.gt.f32.partialorder %v431_v21, 0.0  ;;  %v485_v24 = vmul.f32 0.25, %v431_v21  ;;  %v442_v25 = vadd.f32 %v659_v22, %v827_v48 }
 0x21b   :  { %519 = vst [vmem:[#allocation8 + $0x50] sm:$0xff] %v503_v23  ;;  %v433_v26 = vpop.f32.mrf.mxu1 }
 0x21c   :  { %v501_v27 = vsel %vm469_vm9, %v431_v21, %v485_v24  ;;  %vm472_vm10 = vcmp.gt.f32.partialorder %v442_v25, 0.0  ;;  %v488_v28 = vmul.f32 0.25, %v442_v25  ;;  %v434_v29 = vadd.f32 %v827_v48, %v433_v26 }
 0x21d   :  { %517 = vst [vmem:[#allocation8 + $0x40] sm:$0xff] %v501_v27  ;;  %v662_v30 = vpop.f32.mrf.mxu1 }
 0x21e   :  { %v504_v31 = vsel %vm472_vm10, %v442_v25, %v488_v28  ;;  %vm470_vm11 = vcmp.gt.f32.partialorder %v434_v29, 0.0  ;;  %v486_v32 = vmul.f32 0.25, %v434_v29  ;;  %v455_v33 = vadd.f32 %v662_v30, %v827_v48 }
 0x21f   :  { %520 = vst [vmem:[#allocation8 + $0x58] sm:$0xff] %v504_v31  ;;  %v446_v34 = vpop.f32.mrf.mxu1 }
 0x220   :  { %v502_v35 = vsel %vm470_vm11, %v434_v29, %v486_v32  ;;  %vm475_vm12 = vcmp.gt.f32.partialorder %v455_v33, 0.0  ;;  %v491_v36 = vmul.f32 0.25, %v455_v33  ;;  %v447_v37 = vadd.f32 %v827_v48, %v446_v34 }
 0x221   :  { %518 = vst [vmem:[#allocation8 + $0x48] sm:$0xff] %v502_v35  ;;  %v663_v38 = vpop.f32.mrf.mxu1 }
 0x222   :  { %v507_v39 = vsel %vm475_vm12, %v455_v33, %v491_v36  ;;  %vm473_vm13 = vcmp.gt.f32.partialorder %v447_v37, 0.0  ;;  %v489_v40 = vmul.f32 0.25, %v447_v37  ;;  %v458_v41 = vadd.f32 %v663_v38, %v827_v48 }
 0x223   :  { %523 = vst [vmem:[#allocation8 + $0x70] sm:$0xff] %v507_v39  ;;  %v449_v42 = vpop.f32.mrf.mxu1 }
 0x224   :  { %v505_v43 = vsel %vm473_vm13, %v447_v37, %v489_v40  ;;  %vm476_vm14 = vcmp.gt.f32.partialorder %v458_v41, 0.0  ;;  %v492_v44 = vmul.f32 0.25, %v458_v41  ;;  %v450_v45 = vadd.f32 %v827_v48, %v449_v42 }
 0x225   :  { %521 = vst [vmem:[#allocation8 + $0x60] sm:$0xff] %v505_v43 }
 0x226   :  { %v508_v46 = vsel %vm476_vm14, %v458_v41, %v492_v44  ;;  %vm474_vm15 = vcmp.gt.f32.partialorder %v450_v45, 0.0  ;;  %v490_v47 = vmul.f32 0.25, %v450_v45 }
 0x227   :  { %524 = vst [vmem:[#allocation8 + $0x78] sm:$0xff] %v508_v46 }
 0x228   :  { %v506_v49 = vsel %vm474_vm15, %v450_v45, %v490_v47 }
 0x229   :  { %522 = vst [vmem:[#allocation8 + $0x68] sm:$0xff] %v506_v49 }
 0x22a   :  { %767 = shalt.err (!%p764_p5)
}
 0x22b   :  { %s788_s7 = smov 128   ;;  %s789_s8 = smov 8  }
 0x22c   :  { %536 = dma.vmem_to_hbm [thread:$0]  %s531_s5, 2048, %s852_s4, [#allocation4], %s788_s7, %s788_s7, %s789_s8  }
 0x22d   :  { %780 = dma.done.wait [#allocation4], 2048  }
 0x22e   :  { %781 = vsyncadd [#allocation4], 4294965248 }
 0x22f   :  { %540 = vsyncpa [#allocation3], 1 }
 0x230   :  { %541 = vsyncpa [#allocation6], 1 }
 0x231   :  { %542 = vsyncpa [#allocation4], 1 }

</bundles_post_ra>
